<compile_context>
chip_gen: v6e
topology: v6e:2x2x1
jax: 0.10.0
libtpu: 0.0.40
codegen_flags: <defaults>
</compile_context>

<pallas_src>
import jax
import jax.numpy as jnp
from jax import lax
from jax.experimental import pallas as pl
from jax.experimental.pallas import tpu as pltpu

LN_EPS = 1e-5


def gcn_layer_kernel(rel_ref, x_ref, wt_ref, gamma_ref, beta_ref, o_ref):
    # rel_ref:   (Bb, N, N)
    # x_ref:     (Bb, N, D)
    # wt_ref:    (D, D)   = W.T (pre-transposed in the wrapper)
    # gamma_ref: (1, D)
    # beta_ref:  (1, D)
    # o_ref:     (Bb, N, D)
    bb, n, d = x_ref.shape
    x = x_ref[...]                                        # native dtype (f32/bf16)

    # ctx = rel @ (x @ W.T)   (reassociated: Linear is applied per row, so this
    # is mathematically identical to (rel @ x) @ W.T).
    # One big MXU matmul over all Bb*N rows -> fills the systolic array.
    xw = jnp.dot(x.reshape(bb * n, d), wt_ref[...],
                 preferred_element_type=jnp.float32)      # (Bb*N, D), f32 acc
    xw = xw.astype(x.dtype).reshape(bb, n, d)

    # Batched rel @ xw for the batch elements in this block.
    ctx = jnp.einsum('bij,bjd->bid', rel_ref[...], xw,
                     preferred_element_type=jnp.float32)  # (Bb, N, D), f32

    # residual add (dropout p=0.0 is identity)
    # TODO(synk): training-mode dropout (p>0) not implemented; eval semantics only.
    h = x.astype(jnp.float32) + ctx                       # (Bb, N, D)

    # LayerNorm over last dim (biased variance, like torch.nn.LayerNorm), f32.
    mean = jnp.mean(h, axis=-1, keepdims=True)            # (Bb, N, 1)
    centered = h - mean
    var = jnp.mean(centered * centered, axis=-1, keepdims=True)
    normed = centered * lax.rsqrt(var + LN_EPS)           # rsqrt -> EUP slot

    y = (normed * gamma_ref[...].astype(jnp.float32)
         + beta_ref[...].astype(jnp.float32))
    o_ref[...] = y.astype(o_ref.dtype)


def _choose_block_b(B, N, D, itemsize, vmem_budget_bytes=24 << 20):
    """Largest divisor Bb of B whose per-step working set fits a conservative
    VMEM budget (portable to v7x's 64 MiB / 32 MiB scoped default)."""
    best = 1
    for bb in range(1, B + 1):
        if B % bb:
            continue
        streamed = 2 * bb * (N * N + 2 * N * D) * itemsize   # dbl-buffered rel/x/out
        resident = (D * D + 2 * D) * itemsize                # W.T, gamma, beta
        interm = 3 * bb * N * D * 4                          # f32 intermediates
        if streamed + resident + interm <= vmem_budget_bytes:
            best = bb
    return best


def gcn_layer(node_fts, rel_edges, weight, gamma, beta):
    """node_fts: (B, N, D), rel_edges: (B, N, N), weight: (D, D) (PyTorch
    nn.Linear weight, y = x @ W.T), gamma/beta: (D,). Returns (B, N, D)."""
    B, N, D = node_fts.shape
    dt = node_fts.dtype
    itemsize = jnp.dtype(dt).itemsize

    wt = weight.T                          # one-time transpose, outside the kernel
    gamma2 = gamma.reshape(1, D)
    beta2 = beta.reshape(1, D)

    bb = _choose_block_b(B, N, D, itemsize)
    grid = (B // bb,)

    bytes_accessed = ((B * N * N + 2 * B * N * D) * itemsize
                      + (D * D + 2 * D) * itemsize)
    cost = pl.CostEstimate(
        flops=2 * B * N * N * D + 2 * B * N * D * D,
        transcendentals=B * N,
        bytes_accessed=bytes_accessed,
    )

    return pl.pallas_call(
        gcn_layer_kernel,
        out_shape=jax.ShapeDtypeStruct((B, N, D), dt),
        grid_spec=pltpu.PrefetchScalarGridSpec(
            num_scalar_prefetch=0,
            grid=grid,
            in_specs=[
                pl.BlockSpec((bb, N, N), lambda i: (i, 0, 0)),   # rel_edges
                pl.BlockSpec((bb, N, D), lambda i: (i, 0, 0)),   # node_fts
                pl.BlockSpec((D, D), lambda i: (0, 0)),          # W.T (resident)
                pl.BlockSpec((1, D), lambda i: (0, 0)),          # gamma (resident)
                pl.BlockSpec((1, D), lambda i: (0, 0)),          # beta  (resident)
            ],
            out_specs=pl.BlockSpec((bb, N, D), lambda i: (i, 0, 0)),
        ),
        compiler_params=pltpu.CompilerParams(
            dimension_semantics=("parallel",)),   # batch-blocks split across TCs on v7x
        cost_estimate=cost,
    )(rel_edges, node_fts, wt, gamma2, beta2)


def gcn_layer_ref(node_fts, rel_edges, weight, gamma, beta):
    """Pure-JAX reference mirroring the PyTorch forward (eval mode)."""
    agg = jnp.einsum('bij,bjd->bid', rel_edges, node_fts)
    ctx = jnp.einsum('bid,od->bio', agg, weight)            # x @ W.T
    h = node_fts + ctx
    mean = jnp.mean(h, axis=-1, keepdims=True)
    var = jnp.mean((h - mean) ** 2, axis=-1, keepdims=True)
    normed = (h - mean) / jnp.sqrt(var + LN_EPS)
    return normed * gamma + beta


if __name__ == "__main__":
    # Small shapes consistent with the module's forward contract.
    B, N, D = 2, 8, 32   # batch, num_nodes, embed_size

    key = jax.random.PRNGKey(0)
    k1, k2, k3 = jax.random.split(key, 3)

    node_fts = jax.random.normal(k1, (B, N, D), dtype=jnp.float32)
    rel_edges = jax.random.uniform(k2, (B, N, N), dtype=jnp.float32)
    # row-normalize like a typical adjacency (not required, just sensible data)
    rel_edges = rel_edges / jnp.sum(rel_edges, axis=-1, keepdims=True)

    # Deterministic parameter init (nn.Linear default-style uniform; LN default affine).
    bound = 1.0 / (D ** 0.5)
    weight = jax.random.uniform(k3, (D, D), dtype=jnp.float32,
                                minval=-bound, maxval=bound)
    gamma = jnp.ones((D,), dtype=jnp.float32)
    beta = jnp.zeros((D,), dtype=jnp.float32)

    out = gcn_layer(node_fts, rel_edges, weight, gamma, beta)
    out = jax.block_until_ready(out)

    ref = gcn_layer_ref(node_fts, rel_edges, weight, gamma, beta)
    assert out.shape == (B, N, D)
    # Reassociated matmul order changes f32 accumulation slightly; 1e-4 tol.
    assert jnp.allclose(out, ref, atol=1e-4, rtol=1e-4), "mismatch vs reference"

    print("KERNEL_OK")
</pallas_src>

<mosaic_0001>
module attributes {stable_mosaic.version = 11 : i64} {
  func.func @gcn_layer_kernel(%arg0: i32, %arg1: memref<2x8x8xf32, #tpu.memory_space<vmem>>, %arg2: memref<2x8x32xf32, #tpu.memory_space<vmem>>, %arg3: memref<32x32xf32, #tpu.memory_space<vmem>>, %arg4: memref<1x32xf32, #tpu.memory_space<vmem>>, %arg5: memref<1x32xf32, #tpu.memory_space<vmem>>, %arg6: memref<2x8x32xf32, #tpu.memory_space<vmem>>) attributes {dimension_semantics = [#tpu.dimension_semantics<parallel>], iteration_bounds = array<i64: 1>, scalar_prefetch = 0 : i64, scratch_operands = 0 : i64, tpu.core_type = #tpu.core_type<tc>, window_params = [{transform_indices = @transform_0, window_bounds = array<i64: 2, 8, 8>}, {transform_indices = @transform_1, window_bounds = array<i64: 2, 8, 32>}, {pipeline_mode = #tpu.pipeline_mode<synchronous>, transform_indices = @transform_2, window_bounds = array<i64: 32, 32>}, {pipeline_mode = #tpu.pipeline_mode<synchronous>, transform_indices = @transform_3, window_bounds = array<i64: 1, 32>}, {pipeline_mode = #tpu.pipeline_mode<synchronous>, transform_indices = @transform_4, window_bounds = array<i64: 1, 32>}, {transform_indices = @transform_5, window_bounds = array<i64: 2, 8, 32>}]} {
    %c0 = arith.constant 0 : index
    %c0_0 = arith.constant 0 : index
    %c0_1 = arith.constant 0 : index
    %0 = vector.load %arg2[%c0, %c0_0, %c0_1] : memref<2x8x32xf32, #tpu.memory_space<vmem>>, vector<2x8x32xf32>
    %1 = vector.shape_cast %0 : vector<2x8x32xf32> to vector<16x32xf32>
    %c0_2 = arith.constant 0 : index
    %c0_3 = arith.constant 0 : index
    %2 = vector.load %arg3[%c0_2, %c0_3] : memref<32x32xf32, #tpu.memory_space<vmem>>, vector<32x32xf32>
    %cst = arith.constant dense<0.000000e+00> : vector<16x32xf32>
    %3 = tpu.matmul %1, %2, %cst {dimension_numbers = #tpu.dot_dimension_numbers<[1], [0], [0], [1], [0, 0, 1, 1], [], []>} : vector<16x32xf32>, vector<32x32xf32>, vector<16x32xf32> -> vector<16x32xf32>
    %4 = vector.shape_cast %3 : vector<16x32xf32> to vector<2x8x32xf32>
    %c0_4 = arith.constant 0 : index
    %c0_5 = arith.constant 0 : index
    %c0_6 = arith.constant 0 : index
    %5 = vector.load %arg1[%c0_4, %c0_5, %c0_6] : memref<2x8x8xf32, #tpu.memory_space<vmem>>, vector<2x8x8xf32>
    "tpu.trace_start"() <{level = 10 : i32, message = "bij,bjd->bid"}> : () -> ()
    %cst_7 = arith.constant dense<0.000000e+00> : vector<2x8x32xf32>
    %6 = tpu.matmul %5, %4, %cst_7 {dimension_numbers = #tpu.dot_dimension_numbers<[2], [1], [1], [2], [0, 0, 0, 1, 1, 2], [0], [0]>} : vector<2x8x8xf32>, vector<2x8x32xf32>, vector<2x8x32xf32> -> vector<2x8x32xf32>
    "tpu.trace_stop"() : () -> ()
    %7 = arith.addf %0, %6 : vector<2x8x32xf32>
    %cst_8 = arith.constant dense<0.000000e+00> : vector<2x8xf32>
    %8 = vector.multi_reduction <add>, %7, %cst_8 [2] : vector<2x8x32xf32> to vector<2x8xf32>
    %9 = vector.shape_cast %8 : vector<2x8xf32> to vector<2x8x1xf32>
    %cst_9 = arith.constant 3.200000e+01 : f32
    %10 = vector.broadcast %cst_9 : f32 to vector<2x8x1xf32>
    %11 = arith.divf %9, %10 : vector<2x8x1xf32>
    %12 = vector.broadcast %11 : vector<2x8x1xf32> to vector<2x8x32xf32>
    %13 = arith.subf %7, %12 : vector<2x8x32xf32>
    %14 = arith.mulf %13, %13 : vector<2x8x32xf32>
    %cst_10 = arith.constant dense<0.000000e+00> : vector<2x8xf32>
    %15 = vector.multi_reduction <add>, %14, %cst_10 [2] : vector<2x8x32xf32> to vector<2x8xf32>
    %16 = vector.shape_cast %15 : vector<2x8xf32> to vector<2x8x1xf32>
    %cst_11 = arith.constant 3.200000e+01 : f32
    %17 = vector.broadcast %cst_11 : f32 to vector<2x8x1xf32>
    %18 = arith.divf %16, %17 : vector<2x8x1xf32>
    %cst_12 = arith.constant 9.99999974E-6 : f32
    %19 = vector.broadcast %cst_12 : f32 to vector<2x8x1xf32>
    %20 = arith.addf %18, %19 : vector<2x8x1xf32>
    %21 = math.rsqrt %20 : vector<2x8x1xf32>
    %22 = vector.broadcast %21 : vector<2x8x1xf32> to vector<2x8x32xf32>
    %23 = arith.mulf %13, %22 : vector<2x8x32xf32>
    %c0_13 = arith.constant 0 : index
    %c0_14 = arith.constant 0 : index
    %24 = vector.load %arg4[%c0_13, %c0_14] : memref<1x32xf32, #tpu.memory_space<vmem>>, vector<1x32xf32>
    %25 = vector.shape_cast %24 : vector<1x32xf32> to vector<1x1x32xf32>
    %26 = vector.broadcast %25 : vector<1x1x32xf32> to vector<2x8x32xf32>
    %27 = arith.mulf %23, %26 : vector<2x8x32xf32>
    %c0_15 = arith.constant 0 : index
    %c0_16 = arith.constant 0 : index
    %28 = vector.load %arg5[%c0_15, %c0_16] : memref<1x32xf32, #tpu.memory_space<vmem>>, vector<1x32xf32>
    %29 = vector.shape_cast %28 : vector<1x32xf32> to vector<1x1x32xf32>
    %30 = vector.broadcast %29 : vector<1x1x32xf32> to vector<2x8x32xf32>
    %31 = arith.addf %27, %30 : vector<2x8x32xf32>
    %c0_17 = arith.constant 0 : index
    %c0_18 = arith.constant 0 : index
    %c0_19 = arith.constant 0 : index
    %32 = vector.load %arg6[%c0_17, %c0_18, %c0_19] : memref<2x8x32xf32, #tpu.memory_space<vmem>>, vector<2x8x32xf32>
    tpu.vector_store %arg6[%c0_17, %c0_18, %c0_19], %31 {strides = array<i32>} : memref<2x8x32xf32, #tpu.memory_space<vmem>>, vector<2x8x32xf32>,
    return
  }
  func.func @transform_0(%arg0: i32) -> (i32, i32, i32) {
    %c0_i32 = arith.constant 0 : i32
    %c0_i32_0 = arith.constant 0 : i32
    %c0_i32_1 = arith.constant 0 : i32
    return %arg0, %c0_i32, %c0_i32_0 : i32, i32, i32
  }
  func.func @transform_1(%arg0: i32) -> (i32, i32, i32) {
    %c0_i32 = arith.constant 0 : i32
    %c0_i32_0 = arith.constant 0 : i32
    %c0_i32_1 = arith.constant 0 : i32
    return %arg0, %c0_i32, %c0_i32_0 : i32, i32, i32
  }
  func.func @transform_2(%arg0: i32) -> (i32, i32) {
    %c0_i32 = arith.constant 0 : i32
    %c0_i32_0 = arith.constant 0 : i32
    %c0_i32_1 = arith.constant 0 : i32
    return %c0_i32, %c0_i32_0 : i32, i32
  }
  func.func @transform_3(%arg0: i32) -> (i32, i32) {
    %c0_i32 = arith.constant 0 : i32
    %c0_i32_0 = arith.constant 0 : i32
    %c0_i32_1 = arith.constant 0 : i32
    return %c0_i32, %c0_i32_0 : i32, i32
  }
  func.func @transform_4(%arg0: i32) -> (i32, i32) {
    %c0_i32 = arith.constant 0 : i32
    %c0_i32_0 = arith.constant 0 : i32
    %c0_i32_1 = arith.constant 0 : i32
    return %c0_i32, %c0_i32_0 : i32, i32
  }
  func.func @transform_5(%arg0: i32) -> (i32, i32, i32) {
    %c0_i32 = arith.constant 0 : i32
    %c0_i32_0 = arith.constant 0 : i32
    %c0_i32_1 = arith.constant 0 : i32
    return %arg0, %c0_i32, %c0_i32_0 : i32, i32, i32
  }
}

</mosaic_0001>

<bundles_post_ra>
// kernel: tpu_custom_call.1
= control target key start
LH: loop header
LB: loop body
LE: loop exit
PB: predicated region body
PF: predicated region fallthrough
CT: control target
= control target key end

     0   :  { %10 = vsyncpa [#allocation3], 0  ;;  %s577_s0 = inlined_call_operand.hbm [shape: f32[2,8,8], index: 0, kind: input, shape index: {}]   ;;  %s578_s1 = inlined_call_operand.hbm [shape: f32[2,8,32], index: 1, kind: input, shape index: {}]   ;;  %s579_s2 = inlined_call_operand.hbm [shape: f32[32,32], index: 2, kind: input, shape index: {}]   ;;  %s580_s3 = inlined_call_operand.vmem [shape: f32[1,32], index: 3, kind: input, shape index: {}]   ;;  %s581_s4 = inlined_call_operand.vmem [shape: f32[1,32], index: 4, kind: input, shape index: {}]   ;;  %s582_s5 = inlined_call_operand.hbm [shape: f32[2,8,32], index: 5, kind: output, shape index: {}]  }
   0x1   :  { %11 = vsyncpa [#allocation6], 0 }
   0x2   :  { %12 = vsyncpa [#allocation4], 0  ;;  %s501_s18 = smov [#allocation5]   ;;  %s502_s20 = smov [#allocation2]  }
   0x3   :  { %s30_s19 = sshll.u32 %s501_s18, 4  ;;  %s18_s21 = sshll.u32 %s502_s20, 4  ;;  %s31_s19 = int_to_ptr.vmem [resolvable:$true] %s30_s19  ;;  %s19_s21 = int_to_ptr.vmem [resolvable:$true] %s18_s21 }
   0x4   :  { %s423_s22 = scalar_lea.vmem %s31_s19, 256  ;;  %p428_p1 = scmp.lt.s32.totalorder %s31_s19, %s31_s19 }
   0x5   :  { %p424_p0 = scmp.ne.s32.totalorder %s31_s19, %s423_s22  ;;  %p429_p2 = scmp.lt.s32.totalorder %s423_s22, %s423_s22 }
   0x7   :  { %p430_p3 = por %p429_p2, %p428_p1 }
   0x9   :  { %p431_p4 = pnand %p430_p3, %p424_p0 }
   0xb   :  { %434 = shalt.err (!%p431_p4)
}
   0xc   :  { %s503_s23 = smov 128   ;;  %s504_s24 = smov 8  }
   0xd   :  { %36 = dma.hbm_to_vmem [thread:$0]  %s578_s1, 256, %s31_s19, [#allocation6], %s503_s23, %s503_s23, %s504_s24  }
   0xe   :  { %s443_s27 = scalar_lea.vmem %s19_s21, 256  ;;  %p448_p6 = scmp.lt.s32.totalorder %s19_s21, %s19_s21 }
   0xf   :  { %p444_p5 = scmp.ne.s32.totalorder %s19_s21, %s443_s27  ;;  %p449_p7 = scmp.lt.s32.totalorder %s443_s27, %s443_s27 }
  0x11   :  { %p450_p8 = por %p449_p7, %p448_p6 }
  0x13   :  { %p451_p9 = pnand %p450_p8, %p444_p5 }
  0x15   :  { %454 = shalt.err (!%p451_p9)
}
  0x16   :  { %24 = dma.hbm_to_vmem [thread:$0]  %s577_s0, 256, %s19_s21, [#allocation3], %s503_s23, %s503_s23, %s504_s24  }
  0x17   :  { %s505_s30 = smov [#allocation7]  }
  0x18   :  { %s42_s6 = sshll.u32 %s505_s30, 4  ;;  %s43_s6 = int_to_ptr.vmem [resolvable:$true] %s42_s6 }
  0x19   :  { %s463_s7 = scalar_lea.vmem %s43_s6, 512  ;;  %p468_p11 = scmp.lt.s32.totalorder %s43_s6, %s43_s6 }
  0x1a   :  { %p464_p10 = scmp.ne.s32.totalorder %s43_s6, %s463_s7  ;;  %p469_p12 = scmp.lt.s32.totalorder %s463_s7, %s463_s7 }
  0x1c   :  { %p470_p13 = por %p469_p12, %p468_p11 }
  0x1e   :  { %p471_p0 = pnand %p470_p13, %p464_p10 }
  0x20   :  { %474 = shalt.err (!%p471_p0)
}
  0x21   :  { %48 = dma.hbm_to_vmem [thread:$0]  %s579_s2, 512, %s43_s6, [#allocation6], %s503_s23, %s503_s23, %s504_s24  }
  0x22   :  { %495 = dma.done.wait [#allocation3], 256  }
  0x23   :  { %496 = vsyncadd [#allocation3], 4294967040 }
  0x24   :  { %497 = dma.done.wait [#allocation6], 768  }
  0x25   :  { %498 = vsyncadd [#allocation6], 4294966528  ;;  %vm68_vm0 = vcmask 261120   ;;  %v67_v0 = vld [vmem:[#allocation7 + $0x18] sm:$0xff]  ;;  %v66_v1 = vld [vmem:[#allocation7 + $0x10] sm:$0xff]  ;;  %v506_v6 = vmov 0.0  }
  0x26   :  { %382 = vmatprep.subr.mxu0 %v67_v0  ;;  %v62_v2 = vld [vmem:[#allocation5] sm:$0xff]  ;;  %v65_v3 = vld [vmem:[#allocation7 + $0x8] sm:$0xff]  ;;  %v64_v4 = vld [vmem:[#allocation7] sm:$0xff]  ;;  %393 = vmatprep.subr.mxu1 %v506_v6  ;;  %vm507_vm1 = vmmov 0   ;;  %vm152_vm2 = vcmask 64512   ;;  %s508_s11 = smov [#allocation8]  }
  0x27   :  { %383 = vmatpush3.msra.mxu0 %v67_v0  ;;  %390 = vmatprep.mubr.msk.f32.mxu0 %vm68_vm0, %v62_v2  ;;  %v63_v5 = vld [vmem:[#allocation5 + $0x8] sm:$0xff]  ;;  %v150_v8 = vld [vmem:[#allocation2] sm:$0xff]  ;;  %v151_v10 = vld [vmem:[#allocation2 + $0x8] sm:$0xff]  ;;  %s353_s12 = sshll.u32 %s508_s11, 4  ;;  %s354_s12 = int_to_ptr.vmem [resolvable:$true] %s353_s12 }
  0x28   :  { %384 = vmatprep.subr.mxu0 %v66_v1  ;;  %395 = vmatprep.mubr.msk.f32.mxu1 %vm507_vm1, %v506_v6  ;;  %v370_v36 = vld [vmem:[%s580_s3] ss:$0 sm:$0xff]  ;;  %s475_s13 = scalar_lea.vmem %s354_s12, 256  ;;  %p480_p2 = scmp.lt.s32.totalorder %s354_s12, %s354_s12 }
  0x29   :  { %385 = vmatpush3.msra.mxu0 %v66_v1  ;;  %v371_v38 = vld [vmem:[%s581_s4] ss:$0 sm:$0xff]  ;;  %p476_p1 = scmp.ne.s32.totalorder %s354_s12, %s475_s13  ;;  %p481_p3 = scmp.lt.s32.totalorder %s475_s13, %s475_s13 }
  0x2a   :  { %386 = vmatprep.subr.mxu0 %v65_v3 }
  0x2b   :  { %387 = vmatpush3.msra.mxu0 %v65_v3  ;;  %p482_p4 = por %p481_p3, %p480_p2 }
  0x2c   :  { %388 = vmatprep.subr.mxu0 %v64_v4 }
  0x2d   :  { %389 = vmatpush3.msra.mxu0 %v64_v4  ;;  %p483_p5 = pnand %p482_p4, %p476_p1 }
  0x2e   :  { %391 = vmatmul.mubr.msk.f32.vlgmr.msra.gmra.mxu0 %vm68_vm0, %v63_v5 }
  0xee   :  { %v392_v7 = vpop.f32.mrf.mxu0 }
  0xf0   :  { %v141_v9 = vpop.f32.mrf.mxu0 }
  0xf1   :  { %394 = vmatpush3.msra.mxu1 %v141_v9 }
  0xf2   :  { %396 = vmatmul.mubr.msk.f32.vlgmr.msra.gmra.mxu1 %vm152_vm2, %v150_v8  ;;  %398 = vmatprep.subr.mxu1 %v506_v6 }
  0xf3   :  { %399 = vmatpush3.msra.mxu1 %v392_v7  ;;  %400 = vmatprep.mubr.msk.f32.mxu1 %vm507_vm1, %v506_v6 }
  0xf6   :  { %401 = vmatmul.mubr.msk.f32.vlgmr.msra.gmra.mxu1 %vm152_vm2, %v151_v10 }
 0x1b2   :  { %v222_v11 = vpop.f32.mrf.mxu1 }
 0x1b3   :  { %v299_v12 = vadd.f32 %v222_v11, %v62_v2 }
 0x1b4   :  { %v397_v13 = vpop.f32.mrf.mxu1 }
 0x1b5   :  { %v301_v14 = vsel %vm68_vm0, %v299_v12, 0.0 }
 0x1b6   :  { %302 = vadd.xlane.f32.xlu0 %v301_v14  ;;  %v295_v15 = vpop.f32.mrf.mxu1 }
 0x1b7   :  { %v300_v16 = vadd.f32 %v295_v15, %v63_v5 }
 0x1b8   :  { %v402_v17 = vpop.f32.mrf.mxu1 }
 0x1b9   :  { %v304_v18 = vsel %vm68_vm0, %v300_v16, 0.0 }
 0x1ba   :  { %305 = vadd.xlane.f32.xlu0 %v304_v18 }
 0x23f   :  { %v303_v19 = vpop.xlane.xlu0 %302 }
 0x240   :  { %v308_v20 = vmul.f32 0.03125, %v303_v19 }
 0x242   :  { %v310_v21 = vsub.f32 %v299_v12, %v308_v20 }
 0x243   :  { %v306_v22 = vpop.xlane.xlu0 %305 }
 0x244   :  { %v309_v23 = vmul.f32 0.03125, %v306_v22  ;;  %v312_v24 = vmul.f32 %v310_v21, %v310_v21 }
 0x246   :  { %v311_v25 = vsub.f32 %v300_v16, %v309_v23  ;;  %v314_v26 = vsel %vm68_vm0, %v312_v24, 0.0 }
 0x247   :  { %315 = vadd.xlane.f32.xlu1 %v314_v26 }
 0x248   :  { %v313_v27 = vmul.f32 %v311_v25, %v311_v25 }
 0x24a   :  { %v317_v28 = vsel %vm68_vm0, %v313_v27, 0.0 }
 0x24b   :  { %318 = vadd.xlane.f32.xlu1 %v317_v28 }
 0x2d0   :  { %v316_v29 = vpop.xlane.xlu1 %315 }
 0x2d1   :  { %v320_v30 = vmul.f32 0.03125, %v316_v29 }
 0x2d3   :  { %v322_v31 = vadd.f32 1e-05, %v320_v30 }
 0x2d4   :  { %v319_v32 = vpop.xlane.xlu1 %318 }
 0x2d5   :  { %411 = vrsqrt.f32 %v322_v31  ;;  %v321_v33 = vmul.f32 0.03125, %v319_v32 }
 0x2d7   :  { %v323_v34 = vadd.f32 1e-05, %v321_v33 }
 0x2d9   :  { %413 = vrsqrt.f32 %v323_v34 }
 0x2e2   :  { %v412_v35 = vpop.eup %411 }
 0x2e3   :  { %v326_v37 = vmul.f32 %v412_v35, %v310_v21 }
 0x2e5   :  { %v335_v39 = vmul.f32 %v370_v36, %v326_v37 }
 0x2e6   :  { %v414_v40 = vpop.eup %413 }
 0x2e7   :  { %v327_v41 = vmul.f32 %v414_v40, %v311_v25  ;;  %v344_v42 = vadd.f32 %v371_v38, %v335_v39 }
 0x2e9   :  { %v336_v43 = vmul.f32 %v370_v36, %v327_v41  ;;  %346 = vst.msk [vmem:[#allocation8] sm:$0xff] %vm68_vm0, %v344_v42 }
 0x2eb   :  { %v345_v44 = vadd.f32 %v371_v38, %v336_v43 }
 0x2ed   :  { %347 = vst.msk [vmem:[#allocation8 + $0x8] sm:$0xff] %vm68_vm0, %v345_v44 }
 0x2ee   :  { %486 = shalt.err (!%p483_p5)
}
 0x2ef   :  { %359 = dma.vmem_to_hbm [thread:$0]  %s354_s12, 256, %s582_s5, [#allocation4], %s503_s23, %s503_s23, %s504_s24  }
 0x2f0   :  { %499 = dma.done.wait [#allocation4], 256  }
 0x2f1   :  { %500 = vsyncadd [#allocation4], 4294967040 }
 0x2f2   :  { %363 = vsyncpa [#allocation3], 1 }
 0x2f3   :  { %364 = vsyncpa [#allocation6], 1 }
 0x2f4   :  { %365 = vsyncpa [#allocation4], 1 }

</bundles_post_ra>
